<compile_context>
chip_gen: v6e
topology: v6e:2x2x1
jax: 0.10.0
libtpu: 0.0.40
codegen_flags: <defaults>
</compile_context>

<pallas_src>
import functools

import jax
import jax.numpy as jnp
from jax.experimental import pallas as pl
from jax.experimental.pallas import tpu as pltpu

_LANE = 128
_MAX_LANE_TILE = 1024  # roofline saturates at ~512-1024 lanes; bigger only costs VMEM


def _layernorm2d_kernel(x_ref, w_ref, b_ref, o_ref, *, eps: float, inv_c: float):
    # x_ref/o_ref: (NB, C, T)   w_ref/b_ref: (C, 1)
    x = x_ref[...].astype(jnp.float32)
    mean = jnp.sum(x, axis=1, keepdims=True) * inv_c               # (NB, 1, T)
    mean_sq = jnp.sum(x * x, axis=1, keepdims=True) * inv_c        # (NB, 1, T)
    var = jnp.maximum(mean_sq - mean * mean, 0.0)                  # biased variance
    inv_std = jax.lax.rsqrt(var + eps)
    w = w_ref[...][None, :, :]                                     # (1, C, 1)
    b = b_ref[...][None, :, :]
    o_ref[...] = ((x - mean) * inv_std * w + b).astype(o_ref.dtype)


def _vmem_budget(itemsize: int):
    """Generation-aware scoped-VMEM limit and per-input-block budget (bytes)."""
    try:
        phys = int(pltpu.get_tpu_info().vmem_capacity_bytes)
    except Exception:  # pragma: no cover - conservative fallback
        phys = 128 * 1024 * 1024
    # v5e/v6e (128 MiB phys) -> 48 MiB scoped; v7x (64 MiB phys) -> 32 MiB scoped.
    vmem_limit = min(48 * 1024 * 1024, phys // 2)
    # Accounting per input-sized block: x + out each double-buffered (4x) plus
    # ~3 block-sized f32 temporaries inside the body (x_f32, x*x, normalized y).
    denom = 4 + (3 * 4) // max(1, itemsize)       # f32 -> 7, bf16 -> 10
    block_budget = max(vmem_limit // denom, 64 * 1024)
    return vmem_limit, block_budget


def _choose_tiles(N: int, C: int, HW: int, itemsize: int, block_budget: int):
    # Lane tile: largest multiple of 128 <= min(HW, cap, budget).  No divisibility
    # requirement -- the grid uses cdiv and the tail tile is masked by Pallas.
    if HW < _LANE:
        T = HW  # tiny spatial map: full extent (masked vst unavoidable)
    else:
        max_t_budget = block_budget // max(1, C * itemsize)
        cap = min(HW, _MAX_LANE_TILE, max_t_budget)
        T = max(_LANE, (cap // _LANE) * _LANE)
    n_lane = pl.cdiv(HW, T)

    # Fold batch images into one block (free parallelism: stats are per-(n, pixel))
    # to amortize per-grid-step overhead, but (a) stay inside the block budget and
    # (b) keep >= 2 total grid programs so both v7x TensorCores get work.
    NB = 1
    while (N % (NB * 2) == 0
           and (N // (NB * 2)) * n_lane >= 2
           and (NB * 2) * C * T * itemsize <= block_budget):
        NB *= 2
    return NB, T


def layernorm2d(x: jax.Array, weight: jax.Array, bias: jax.Array,
                eps: float = 1e-6) -> jax.Array:
    """x: (N, C, H, W), weight/bias: (C,).  Returns (N, C, H, W)."""
    N, C, H, W = x.shape
    HW = H * W
    itemsize = jnp.dtype(x.dtype).itemsize

    x2 = x.reshape(N, C, HW)                       # free reshape (trailing-dim merge)
    w2 = weight.reshape(C, 1).astype(jnp.float32)
    b2 = bias.reshape(C, 1).astype(jnp.float32)

    vmem_limit, block_budget = _vmem_budget(itemsize)
    NB, T = _choose_tiles(N, C, HW, itemsize, block_budget)
    grid = (N // NB, pl.cdiv(HW, T))

    kernel = functools.partial(_layernorm2d_kernel, eps=float(eps), inv_c=1.0 / C)

    out = pl.pallas_call(
        kernel,
        out_shape=jax.ShapeDtypeStruct((N, C, HW), x.dtype),
        grid_spec=pltpu.PrefetchScalarGridSpec(
            num_scalar_prefetch=0,
            grid=grid,
            in_specs=[
                pl.BlockSpec((NB, C, T), lambda n, j: (n, 0, j)),
                pl.BlockSpec((C, 1), lambda n, j: (0, 0)),
                pl.BlockSpec((C, 1), lambda n, j: (0, 0)),
            ],
            out_specs=pl.BlockSpec((NB, C, T), lambda n, j: (n, 0, j)),
        ),
        compiler_params=pltpu.CompilerParams(
            dimension_semantics=("parallel", "parallel"),
            vmem_limit_bytes=vmem_limit,
        ),
    )(x2, w2, b2)

    return out.reshape(N, C, H, W)


def _reference(x, weight, bias, eps=1e-6):
    u = jnp.mean(x, axis=1, keepdims=True)
    s = jnp.mean((x - u) ** 2, axis=1, keepdims=True)
    y = (x - u) / jnp.sqrt(s + eps)
    return weight[None, :, None, None] * y + bias[None, :, None, None]


if __name__ == "__main__":
    key = jax.random.PRNGKey(0)
    kx, kw, kb = jax.random.split(key, 3)

    N, C, H, W = 2, 4, 16, 16
    x = jax.random.normal(kx, (N, C, H, W), dtype=jnp.float32)
    # Deterministic parameters (shapes from __init__: (num_channels,)).
    weight = 1.0 + 0.1 * jax.random.normal(kw, (C,), dtype=jnp.float32)
    bias = 0.1 * jax.random.normal(kb, (C,), dtype=jnp.float32)

    out = jax.block_until_ready(layernorm2d(x, weight, bias, eps=1e-6))
    ref = _reference(x, weight, bias, eps=1e-6)
    assert out.shape == (N, C, H, W)
    assert jnp.allclose(out, ref, atol=1e-5, rtol=1e-5), "mismatch vs reference"

    # Non-128-multiple spatial extent (14x14 -> HW=196) exercises the masked
    # partial-lane-tile path (no wrapper-side pad/slice anymore).
    x14 = jax.random.normal(kx, (N, C, 14, 14), dtype=jnp.float32)
    out14 = jax.block_until_ready(layernorm2d(x14, weight, bias, eps=1e-6))
    ref14 = _reference(x14, weight, bias, eps=1e-6)
    assert jnp.allclose(out14, ref14, atol=1e-5, rtol=1e-5), "mismatch (partial tile)"

    print("KERNEL_OK")
</pallas_src>

<mosaic_0001>
module attributes {stable_mosaic.version = 11 : i64} {
  func.func @_layernorm2d_kernel(%arg0: i32, %arg1: i32, %arg2: memref<1x4x256xf32, #tpu.memory_space<vmem>>, %arg3: memref<4x1xf32, #tpu.memory_space<vmem>>, %arg4: memref<4x1xf32, #tpu.memory_space<vmem>>, %arg5: memref<1x4x256xf32, #tpu.memory_space<vmem>>) attributes {dimension_semantics = [#tpu.dimension_semantics<parallel>, #tpu.dimension_semantics<parallel>], iteration_bounds = array<i64: 2, 1>, scalar_prefetch = 0 : i64, scratch_operands = 0 : i64, tpu.core_type = #tpu.core_type<tc>, window_params = [{transform_indices = @transform_0, window_bounds = array<i64: 1, 4, 256>}, {pipeline_mode = #tpu.pipeline_mode<synchronous>, transform_indices = @transform_1, window_bounds = array<i64: 4, 1>}, {pipeline_mode = #tpu.pipeline_mode<synchronous>, transform_indices = @transform_2, window_bounds = array<i64: 4, 1>}, {transform_indices = @transform_3, window_bounds = array<i64: 1, 4, 256>}]} {
    %c0 = arith.constant 0 : index
    %c0_0 = arith.constant 0 : index
    %c0_1 = arith.constant 0 : index
    %0 = vector.load %arg2[%c0, %c0_0, %c0_1] : memref<1x4x256xf32, #tpu.memory_space<vmem>>, vector<1x4x256xf32>
    %cst = arith.constant dense<0.000000e+00> : vector<1x256xf32>
    %1 = vector.multi_reduction <add>, %0, %cst [1] : vector<1x4x256xf32> to vector<1x256xf32>
    %2 = vector.shape_cast %1 : vector<1x256xf32> to vector<1x1x256xf32>
    %cst_2 = arith.constant 2.500000e-01 : f32
    %3 = vector.broadcast %cst_2 : f32 to vector<1x1x256xf32>
    %4 = arith.mulf %2, %3 : vector<1x1x256xf32>
    %5 = arith.mulf %0, %0 : vector<1x4x256xf32>
    %cst_3 = arith.constant dense<0.000000e+00> : vector<1x256xf32>
    %6 = vector.multi_reduction <add>, %5, %cst_3 [1] : vector<1x4x256xf32> to vector<1x256xf32>
    %7 = vector.shape_cast %6 : vector<1x256xf32> to vector<1x1x256xf32>
    %cst_4 = arith.constant 2.500000e-01 : f32
    %8 = vector.broadcast %cst_4 : f32 to vector<1x1x256xf32>
    %9 = arith.mulf %7, %8 : vector<1x1x256xf32>
    %10 = arith.mulf %4, %4 : vector<1x1x256xf32>
    %11 = arith.subf %9, %10 : vector<1x1x256xf32>
    %cst_5 = arith.constant 0.000000e+00 : f32
    %12 = vector.broadcast %cst_5 : f32 to vector<1x1x256xf32>
    %13 = arith.maximumf %11, %12 : vector<1x1x256xf32>
    %cst_6 = arith.constant 9.99999997E-7 : f32
    %14 = vector.broadcast %cst_6 : f32 to vector<1x1x256xf32>
    %15 = arith.addf %13, %14 : vector<1x1x256xf32>
    %16 = math.rsqrt %15 : vector<1x1x256xf32>
    %c0_7 = arith.constant 0 : index
    %c0_8 = arith.constant 0 : index
    %17 = vector.load %arg3[%c0_7, %c0_8] : memref<4x1xf32, #tpu.memory_space<vmem>>, vector<4x1xf32>
    %18 = vector.shape_cast %17 : vector<4x1xf32> to vector<1x4x1xf32>
    %c0_9 = arith.constant 0 : index
    %c0_10 = arith.constant 0 : index
    %19 = vector.load %arg4[%c0_9, %c0_10] : memref<4x1xf32, #tpu.memory_space<vmem>>, vector<4x1xf32>
    %20 = vector.shape_cast %19 : vector<4x1xf32> to vector<1x4x1xf32>
    %21 = vector.broadcast %4 : vector<1x1x256xf32> to vector<1x4x256xf32>
    %22 = arith.subf %0, %21 : vector<1x4x256xf32>
    %23 = vector.broadcast %16 : vector<1x1x256xf32> to vector<1x4x256xf32>
    %24 = arith.mulf %22, %23 : vector<1x4x256xf32>
    %25 = vector.broadcast %18 : vector<1x4x1xf32> to vector<1x4x256xf32>
    %26 = arith.mulf %24, %25 : vector<1x4x256xf32>
    %27 = vector.broadcast %20 : vector<1x4x1xf32> to vector<1x4x256xf32>
    %28 = arith.addf %26, %27 : vector<1x4x256xf32>
    %c0_11 = arith.constant 0 : index
    %c0_12 = arith.constant 0 : index
    %c0_13 = arith.constant 0 : index
    %29 = vector.load %arg5[%c0_11, %c0_12, %c0_13] : memref<1x4x256xf32, #tpu.memory_space<vmem>>, vector<1x4x256xf32>
    tpu.vector_store %arg5[%c0_11, %c0_12, %c0_13], %28 {strides = array<i32>} : memref<1x4x256xf32, #tpu.memory_space<vmem>>, vector<1x4x256xf32>,
    return
  }
  func.func @transform_0(%arg0: i32, %arg1: i32) -> (i32, i32, i32) {
    %c0_i32 = arith.constant 0 : i32
    %c0_i32_0 = arith.constant 0 : i32
    return %arg0, %c0_i32, %arg1 : i32, i32, i32
  }
  func.func @transform_1(%arg0: i32, %arg1: i32) -> (i32, i32) {
    %c0_i32 = arith.constant 0 : i32
    %c0_i32_0 = arith.constant 0 : i32
    %c0_i32_1 = arith.constant 0 : i32
    return %c0_i32, %c0_i32_0 : i32, i32
  }
  func.func @transform_2(%arg0: i32, %arg1: i32) -> (i32, i32) {
    %c0_i32 = arith.constant 0 : i32
    %c0_i32_0 = arith.constant 0 : i32
    %c0_i32_1 = arith.constant 0 : i32
    return %c0_i32, %c0_i32_0 : i32, i32
  }
  func.func @transform_3(%arg0: i32, %arg1: i32) -> (i32, i32, i32) {
    %c0_i32 = arith.constant 0 : i32
    %c0_i32_0 = arith.constant 0 : i32
    return %arg0, %c0_i32, %arg1 : i32, i32, i32
  }
}

</mosaic_0001>

<bundles_post_ra>
// kernel: tpu_custom_call.1
= control target key start
LH: loop header
LB: loop body
LE: loop exit
PB: predicated region body
PF: predicated region fallthrough
CT: control target
= control target key end

     0   :  { %8 = vsyncpa [#allocation3], 0  ;;  %s763_s0 = inlined_call_operand.hbm [shape: f32[2,4,256], index: 0, kind: input, shape index: {}]   ;;  %s764_s1 = inlined_call_operand.vmem [shape: f32[4,1], index: 1, kind: input, shape index: {}]   ;;  %s765_s2 = inlined_call_operand.vmem [shape: f32[4,1], index: 2, kind: input, shape index: {}]   ;;  %s766_s3 = inlined_call_operand.hbm [shape: f32[2,4,256], index: 3, kind: output, shape index: {}]  }
   0x1   :  { %10 = vsyncpa [#allocation3 + $0x1], 0 }
   0x2   :  { %11 = vsyncpa [#allocation4], 0 }
   0x3   :  { %13 = vsyncpa [#allocation4 + $0x1], 0  ;;  %s619_s12 = smov 0   ;;  %s621_s13 = smov 0  }
   0x4   :  { %s623_s14 = smov 0   ;;  %s625_s15 = smov 0  }
   0x5   :  { %s627_s16 = smov 0   ;;  %s629_s17 = smov 0  }
   0x6 LB: > { %s398_s18 = sadd.s32 4294967295, %s593_s17   ;;  %s399_s19 = sadd.s32 4294967294, %s593_s17   ;;  %s593_s17 = sphi %s629_s17, %s19_s17   ;;  %s589_s16 = sphi %s627_s16, %s778_s16   ;;  %s585_s15 = sphi %s625_s15, %s777_s15   ;;  %s581_s14 = sphi %s623_s14, %s776_s14   ;;  %s577_s13 = sphi %s621_s13, %s775_s13   ;;  %s573_s12 = sphi %s619_s12, %s774_s12  }
   0x7   : > { %s31_s20 = sadd.s32 1, %s589_s16  ;;  %s40_s21 = sadd.s32 1, %s581_s14 }
   0x8   : > { %p33_p0 = scmp.ge.s32.totalorder %s31_s20, 2  ;;  %p47_p1 = scmp.ne.s32.totalorder %s581_s14, %s577_s13 }
   0x9   : > { %p48_p2 = scmp.eq.s32.totalorder %s593_s17, 0  ;;  %p53_p3 = scmp.ne.s32.totalorder %s577_s13, %s573_s12 }
   0xa   : > { %s780_s20 = smov (%p33_p0, %s31_s20), 0  ;;  %p54_p5 = scmp.eq.s32.totalorder %s398_s18, 0 }
   0xb   : > { %p660_p4 = por %p48_p2, %p47_p1  ;;  %s35_s23 = ssub.s32 %s589_s16, %s780_s20 }
   0xc   : > { %p121_p6 = scmp.eq.s32.totalorder %s398_s18, 1  ;;  %p38_p7 = scmp.eq.s32.totalorder %s35_s23, 0 }
   0xd   : > { %p666_p8 = por %p54_p5, %p53_p3  ;;  %p127_p10 = scmp.eq.s32.totalorder %s399_s19, 1 }
   0xe   : > { %p670_p9 = por %p121_p6, %p47_p1  ;;  %p427_p13 = scmp.lt.s32.totalorder %s593_s17, 2 }
   0xf   : > { %s675_s26 = scalar_select %p38_p7, %s581_s14, %s40_s21  }
  0x10   : > { %p677_p11 = por %p127_p10, %p53_p3  ;;  %s153_s28 = sand.u32 1, %s581_s14  }
  0x11   : > { %s402_s29 = sshll.u32 %s153_s28, 3  ;;  %s413_s30 = sshll.u32 %s589_s16, 7 }
  0x12   : > { %s770_s27 = scalar_select %p677_p11, 1, 0 }
  0x13   : > { %s165_s6 = scalar_lea.hbm %s763_s0, %s413_s30  ;;  %s157_s7 = scalar_lea.vmem [#allocation2], %s402_s29 }
  0x14   : > { %s167_s8 = sshll.u32 %s157_s7, 4  ;;  %p690_p0 = pnand %p427_p13, %p660_p4  ;;  %s168_s8 = int_to_ptr.vmem [resolvable:$true] %s167_s8 }
  0x15   : > { %p405_p1 = scmp.ge.s32.totalorder %s593_s17, 1  ;;  %p172_p2 = scmp.lt.s32.totalorder %s593_s17, 3 }
  0x16   : > { %s154_s10 = scalar_lea.sflag [#allocation3], %s153_s28  ;;  %p487_p3 = pneg %p690_p0 }
  0x17   : > { %s498_s11 = scalar_lea.vmem %s168_s8, 128  ;;  %s595_s18 = smov [#allocation2]  }
  0x18   : > { %p499_p5 = scmp.ne.s32.totalorder %s168_s8, %s498_s11  ;;  %s503_s19 = sshll.u32 %s595_s18, 4  ;;  %s504_s19 = int_to_ptr.vmem [resolvable:$false] %s503_s19 }
  0x19   : > { %s505_s21 = scalar_lea.vmem %s504_s19, 256  ;;  %p506_p10 = scmp.lt.s32.totalorder %s168_s8, %s504_s19 }
  0x1a   : > { %p501_p6 = pnand %p499_p5, %p487_p3  ;;  %p507_p12 = scmp.lt.s32.totalorder %s505_s21, %s498_s11 }
  0x1c   : > { %p502_p7 = pneg %p501_p6  ;;  %p508_p4 = por %p507_p12, %p506_p10 }
  0x1e   : > { %p509_p13 = pnand %p508_p4, %p502_p7 }
  0x20   : > { %512 = shalt.err (!%p509_p13)
}
  0x21   : > { %422 = dma.hbm_to_vmem [thread:$0]  (!%p690_p0), %s165_s6, 128, %s168_s8, %s154_s10  }
  0x22   : > { %p173_p11 = pnand %p405_p1, %p172_p2 }
  0x23   : > { %s705_s22 = sand.u32 (!%p173_p11), 1, %s577_s13  }
  0x24   : > { %176 = sbr.rel (%p173_p11) target bundleno = 189 (0xbd), region = 32  ;;  %s406_s23 = sshll.u32 (!%p173_p11), %s705_s22, 3 }
  0x25   : > { %s179_s28 = scalar_lea.sflag (!%p173_p11), [#allocation3], %s705_s22  ;;  %s182_s29 = scalar_lea.vmem (!%p173_p11), [#allocation2], %s406_s23 }
  0x29   : > { %564 = dma.done.wait (%p666_p8), %s179_s28, 128  }
  0x2a   : > { %566 = vsyncadd (%p666_p8), %s179_s28, 4294967168  ;;  %v596_v0 = vmov 0   ;;  %v258_v1 = vld [vmem:[%s764_s1] sm:$0xf]  ;;  %vm211_vm0 = vcmask 1043456   ;;  %v277_v49 = vlaneseq  ;;  %s414_s24 = sshll.u32 %s585_s15, 7 }
  0x2b   : > { %479 = vset.pattern.permute.xlu0 %v596_v0  ;;  %v259_v2 = vld [vmem:[%s765_s2] sm:$0xf]  ;;  %v597_v47 = vmov 839922192   ;;  %s204_s7 = scalar_lea.vmem [#allocation5], %s406_s23  ;;  %s312_s11 = scalar_lea.hbm %s766_s3, %s414_s24 }
  0x2c   : > { %272 = vperm.xlu0 %479, %v258_v1   ;;  %v207_v3 = vld [vmem:[%s182_s29] sm:$0xff]  ;;  %v275_v48 = vunpack.c.l.s4 %v597_v47  ;;  %v278_v52 = vshrl.u32 %v277_v49, 7  ;;  %s314_s8 = sshll.u32 %s204_s7, 4  ;;  %s298_s18 = scalar_lea.sflag [#allocation4], %s705_s22  ;;  %s315_s8 = int_to_ptr.vmem [resolvable:$true] %s314_s8 }
  0x2d   : > { %v209_v4 = vcombine.high %v207_v3, %v207_v3  ;;  %v228_v5 = vmul.f32 %v207_v3, %v207_v3  ;;  %v212_v6 = vsel %vm211_vm0, %v207_v3, 0.0  ;;  %s513_s19 = scalar_lea.vmem %s315_s8, 128  ;;  %s598_s21 = smov [#allocation5]  }
  0x2e   : > { %v213_v9 = vrot.slane %v212_v6, 4  ;;  %v276_v51 = vunpack.c.0.s8 %v275_v48  ;;  %p514_p8 = scmp.ne.s32.totalorder %s315_s8, %s513_s19  ;;  %s517_s15 = sshll.u32 %s598_s21, 4  ;;  %s518_s15 = int_to_ptr.vmem [resolvable:$false] %s517_s15 }
  0x2f   : > { %v219_v7 = vsel %vm211_vm0, %v209_v4, 0.0  ;;  %v230_v8 = vcombine.high %v228_v5, %v228_v5  ;;  %v232_v11 = vsel %vm211_vm0, %v228_v5, 0.0  ;;  %s519_s23 = scalar_lea.vmem %s518_s15, 256  ;;  %p520_p0 = scmp.lt.s32.totalorder %s315_s8, %s518_s15 }
  0x30   : > { %285 = vperm.xlu0 %479, %v259_v2   ;;  %v220_v10 = vrot.slane %v219_v7, 4  ;;  %v214_v13 = vadd.f32 %v213_v9, %v212_v6  ;;  %v233_v14 = vrot.slane %v232_v11, 4  ;;  %v279_v55 = vsub.s32 %v276_v51, %v278_v52  ;;  %p515_p11 = pnand %p514_p8, %p670_p9  ;;  %p521_p1 = scmp.lt.s32.totalorder %s519_s23, %s513_s19 }
  0x31   : > { %v239_v12 = vsel %vm211_vm0, %v230_v8, 0.0 }
  0x32   : > { %v221_v15 = vadd.f32 %v220_v10, %v219_v7  ;;  %v240_v16 = vrot.slane %v239_v12, 4  ;;  %v215_v17 = vrot.slane %v214_v13, 2  ;;  %v234_v18 = vadd.f32 %v233_v14, %v232_v11  ;;  %p516_p12 = pneg %p515_p11  ;;  %p522_p2 = por %p521_p1, %p520_p0 }
  0x34   : > { %v222_v19 = vrot.slane %v221_v15, 2  ;;  %v241_v20 = vadd.f32 %v240_v16, %v239_v12  ;;  %v216_v21 = vadd.f32 %v215_v17, %v214_v13  ;;  %v235_v22 = vrot.slane %v234_v18, 2  ;;  %p523_p3 = pnand %p522_p2, %p516_p12 }
  0x36   : > { %v223_v23 = vadd.f32 %v222_v19, %v221_v15  ;;  %v242_v24 = vrot.slane %v241_v20, 2  ;;  %v217_v25 = vrot.slane %v216_v21, 1  ;;  %v236_v26 = vadd.f32 %v235_v22, %v234_v18 }
  0x38   : > { %v224_v27 = vrot.slane %v223_v23, 1  ;;  %v243_v28 = vadd.f32 %v242_v24, %v241_v20  ;;  %v218_v29 = vadd.f32 %v217_v25, %v216_v21  ;;  %v237_v30 = vrot.slane %v236_v26, 1 }
  0x3a   : > { %v225_v31 = vadd.f32 %v224_v27, %v223_v23  ;;  %v244_v32 = vrot.slane %v243_v28, 1  ;;  %v226_v33 = vmul.f32 0.25, %v218_v29  ;;  %v238_v34 = vadd.f32 %v237_v30, %v236_v26 }
  0x3c   : > { %v227_v35 = vmul.f32 0.25, %v225_v31  ;;  %v245_v36 = vadd.f32 %v244_v32, %v243_v28  ;;  %v246_v37 = vmul.f32 0.25, %v238_v34  ;;  %v248_v38 = vmul.f32 %v226_v33, %v226_v33 }
  0x3e   : > { %v247_v39 = vmul.f32 0.25, %v245_v36  ;;  %v249_v40 = vmul.f32 %v227_v35, %v227_v35  ;;  %v250_v41 = vsub.f32 %v246_v37, %v248_v38  ;;  %v262_v53 = vcombine.low %v226_v33, %v227_v35 }
  0x40   : > { %v251_v42 = vsub.f32 %v247_v39, %v249_v40  ;;  %v252_v43 = vmax.f32 %v250_v41, 0.0  ;;  %v264_v56 = vsub.f32 %v207_v3, %v262_v53 }
  0x42   : > { %v253_v44 = vmax.f32 %v251_v42, 0.0  ;;  %v254_v45 = vadd.f32 1e-06, %v252_v43 }
  0x44   : > { %v255_v46 = vadd.f32 1e-06, %v253_v44  ;;  %481 = vrsqrt.f32 %v254_v45 }
  0x46   : > { %483 = vrsqrt.f32 %v255_v46 }
  0x51   : > { %v482_v50 = vpop.eup %481 }
  0x53   : > { %v484_v54 = vpop.eup %483 }
  0x54   : > { %v267_v57 = vcombine.low %v482_v50, %v484_v54 }
  0x56   : > { %v269_v59 = vmul.f32 %v267_v57, %v264_v56 }
  0xa7   : > { %v273_v58 = vpop.permute.xlu0 %272 }
  0xa8   : > { %v280_v60 = vrot.slane %v273_v58, %v279_v55 }
  0xaa   : > { %v282_v62 = vmul.f32 %v280_v60, %v269_v59 }
  0xab   : > { %v286_v61 = vpop.permute.xlu0 %285 }
  0xac   : > { %v293_v63 = vrot.slane %v286_v61, %v279_v55 }
  0xae   : > { %v295_v0 = vadd.f32 %v293_v63, %v282_v62 }
  0xb0   : > { %296 = vst [vmem:[%s204_s7] sm:$0xff] %v295_v0 }
  0xb1   : > { %526 = shalt.err (!%p523_p3)
}
  0xb2   : > { %s527_s28 = scalar_lea.hbm %s312_s11, 128  ;;  %s531_s30 = scalar_lea.hbm %s766_s3, 256 }
  0xb3   : > { %p528_p5 = scmp.ne.s32.totalorder %s312_s11, %s527_s28  ;;  %p532_p10 = scmp.lt.s32.totalorder %s312_s11, %s766_s3 }
  0xb4   : > { %p533_p4 = scmp.lt.s32.totalorder %s531_s30, %s527_s28 }
  0xb5   : > { %p529_p6 = pnand %p528_p5, %p670_p9 }
  0xb6   : > { %p534_p13 = por %p533_p4, %p532_p10 }
  0xb7   : > { %p530_p7 = pneg %p529_p6 }
  0xb9   : > { %p535_p8 = pnand %p534_p13, %p530_p7 }
  0xbb   : > { %538 = shalt.err (!%p535_p8)
}
  0xbc   : > { %417 = dma.vmem_to_hbm [thread:$0]  (%p670_p9), %s315_s8, 128, %s312_s11, %s298_s18  }
  0xbd PF: > { %s326_s6 = sand.u32 1, %s573_s12   ;;  %p772_p11 = scmp.ne.s32.totalorder %s770_s27, 0 }
  0xbe   : > { %p773_p12 = scmp.ge.s32.totalorder %s593_s17, 2  ;;  %s327_s24 = scalar_lea.sflag [#allocation4], %s326_s6 }
  0xc0   : > { %p424_p0 = pnand %p773_p12, %p772_p11 }
  0xc2   : > { %p425_p1 = pneg %p424_p0 }
  0xc4   : > { %568 = dma.done.wait (%p425_p1), %s327_s24, 128  }
  0xc5   : > { %570 = vsyncadd (%p425_p1), %s327_s24, 4294967168  ;;  %s19_s17 = sadd.s32 1, %s593_s17   ;;  %s774_s12 = smov %s577_s13 }
  0xc6   : > { %p16_p2 = scmp.ge.s32.totalorder %s19_s17, 4   ;;  %s775_s13 = smov %s581_s14 }
  0xc7   : > { %s776_s14 = smov %s675_s26  ;;  %s777_s15 = smov %s589_s16 }
  0xc8   : > { %s778_s16 = smov %s780_s20  ;;  %18 = sbr.rel (!%p16_p2) target bundleno = 6 (0x6), region = 77 }
  0xcd   :  { %332 = vsyncpa [#allocation3], 1 }
  0xce   :  { %334 = vsyncpa [#allocation3 + $0x1], 1 }
  0xcf   :  { %335 = vsyncpa [#allocation4], 1 }
  0xd0   :  { %337 = vsyncpa [#allocation4 + $0x1], 1 }

</bundles_post_ra>
